<compile_context>
chip_gen: v7x
topology: tpu7x:2x2x1
jax: 0.10.0
libtpu: 0.0.40
codegen_flags: <defaults>
</compile_context>

<pallas_src>
import jax
import jax.numpy as jnp
from jax import lax
from jax.experimental import pallas as pl
from jax.experimental.pallas import tpu as pltpu


# ----------------------------- kernel bodies -------------------------------

def _mlp(x, w1_ref, b1_ref, w2_ref, b2_ref, w3_ref, b3_ref):
    """Fk(x): f32 activations, bf16 weights widened at use, f32 accumulation.
    w3/b3 already carry the 1/sqrt(d_q) temperature fold."""
    h1 = jnp.maximum(
        jnp.dot(x, w1_ref[...].astype(jnp.float32),
                preferred_element_type=jnp.float32) + b1_ref[...], 0.0)
    h2 = jnp.maximum(
        jnp.dot(h1, w2_ref[...].astype(jnp.float32),
                preferred_element_type=jnp.float32) + b2_ref[...], 0.0)
    return (jnp.dot(h2, w3_ref[...].astype(jnp.float32),
                    preferred_element_type=jnp.float32) + b3_ref[...])


def selector_kernel_mn(x_ref, w1_ref, b1_ref, w2_ref, b2_ref, w3_ref, b3_ref,
                       q_ref, out_ref):
    """N > 1 path. One grid step handles a tile of x rows; the output block is
    (M, tile_n) — already in the final orientation, batch on the lane axis."""
    k = _mlp(x_ref[...], w1_ref, b1_ref, w2_ref, b2_ref, w3_ref, b3_ref)
    # attn = Q @ K^T computed directly as (M, tile_n): contract on d_q.
    attn = lax.dot_general(q_ref[...], k,
                           dimension_numbers=(((1,), (1,)), ((), ())),
                           preferred_element_type=jnp.float32)
    # softmax over dim=0 of the (M, N) output == axis 0 here (per column).
    m = jnp.max(attn, axis=0, keepdims=True)
    e = jnp.exp(attn - m)
    s = jnp.sum(e, axis=0, keepdims=True)
    out_ref[...] = e / s          # exact divide: columns sum to 1 (f32 rounding)


def selector_kernel_1m(x_ref, w1_ref, b1_ref, w2_ref, b2_ref, w3_ref, b3_ref,
                       q_ref, out_ref):
    """N == 1 path: torch's attn.view(1, -1); output is (1, M) directly."""
    k = _mlp(x_ref[...], w1_ref, b1_ref, w2_ref, b2_ref, w3_ref, b3_ref)
    attn = lax.dot_general(k, q_ref[...],
                           dimension_numbers=(((1,), (1,)), ((), ())),
                           preferred_element_type=jnp.float32)   # (1, M)
    m = jnp.max(attn, axis=-1, keepdims=True)
    e = jnp.exp(attn - m)
    s = jnp.sum(e, axis=-1, keepdims=True)
    out_ref[...] = e / s


# ----------------------------- host wrappers -------------------------------

def prepare_params(params_f32, d_q):
    """One-time host-side transform: fold temperature into w3/b3, cast weights
    to bf16 (biases stay f32)."""
    inv_t = 1.0 / (float(d_q) ** 0.5)
    return {
        "w1": params_f32["w1"].astype(jnp.bfloat16),
        "b1": params_f32["b1"].astype(jnp.float32),
        "w2": params_f32["w2"].astype(jnp.bfloat16),
        "b2": params_f32["b2"].astype(jnp.float32),
        "w3": (params_f32["w3"] * inv_t).astype(jnp.bfloat16),
        "b3": (params_f32["b3"] * inv_t).astype(jnp.float32),
        "d_q": int(d_q),
    }


def selector_forward(x, Q, prepared_params, *, tile_n=128):
    """Pallas equivalent of Selector.forward(x, Q)."""
    if x.ndim == 1:
        x = x.reshape(1, -1)
    N, d_in = x.shape
    M, d_q = Q.shape
    assert prepared_params["d_q"] == d_q, \
        "prepare_params() d_q does not match Q.shape[1]"
    h = prepared_params["w1"].shape[1]

    cost = pl.CostEstimate(
        flops=2 * (N * d_in * h + N * h * h + N * h * d_q + N * M * d_q),
        transcendentals=N * M,
        bytes_accessed=(N * d_in * 4 + M * d_q * 4 + N * M * 4
                        + 2 * (d_in * h + h * h + h * d_q)    # bf16 weights
                        + 4 * (h + h + d_q)),                 # f32 biases
    )

    params = (prepared_params["w1"], prepared_params["b1"],
              prepared_params["w2"], prepared_params["b2"],
              prepared_params["w3"], prepared_params["b3"])

    if N == 1:
        vmem = pl.BlockSpec(memory_space=pltpu.MemorySpace.VMEM)
        return pl.pallas_call(
            selector_kernel_1m,
            out_shape=jax.ShapeDtypeStruct((1, M), jnp.float32),
            in_specs=[vmem] * 8,
            out_specs=vmem,
            cost_estimate=cost,
        )(x, *params, Q)

    # N > 1: grid over tiles of x rows.  Weights / biases / Q use constant
    # index_maps -> DMA'd once, resident in VMEM across grid steps.
    tn = tile_n if N >= tile_n else N
    grid = (pl.cdiv(N, tn),)

    def const(i):
        return (0, 0)

    in_specs = [
        pl.BlockSpec((tn, d_in), lambda i: (i, 0)),   # x: tiled over batch
        pl.BlockSpec((d_in, h), const),               # w1 (resident)
        pl.BlockSpec((1, h), const),                  # b1
        pl.BlockSpec((h, h), const),                  # w2 (resident)
        pl.BlockSpec((1, h), const),                  # b2
        pl.BlockSpec((h, d_q), const),                # w3
        pl.BlockSpec((1, d_q), const),                # b3
        pl.BlockSpec((M, d_q), const),                # Q
    ]
    out_spec = pl.BlockSpec((M, tn), lambda i: (0, i))  # batch on lane axis

    return pl.pallas_call(
        selector_kernel_mn,
        out_shape=jax.ShapeDtypeStruct((M, N), jnp.float32),
        grid=grid,
        in_specs=in_specs,
        out_specs=out_spec,
        cost_estimate=cost,
        compiler_params=pltpu.CompilerParams(
            dimension_semantics=("parallel",)),       # v7x: shard over 2 TCs
    )(x, *params, Q)


def _reference_forward(x, Q, params_f32, d_q):
    if x.ndim == 1:
        x = x.reshape(1, -1)
    h1 = jax.nn.relu(x @ params_f32["w1"] + params_f32["b1"])
    h2 = jax.nn.relu(h1 @ params_f32["w2"] + params_f32["b2"])
    k = h2 @ params_f32["w3"] + params_f32["b3"]
    attn = (Q @ k.T) / (float(d_q) ** 0.5)
    attn = jax.nn.softmax(attn, axis=0)
    if x.shape[0] == 1:
        attn = attn.reshape(1, -1)
    return attn


if __name__ == "__main__":
    # Small shapes consistent with the module: x (N, d_input), Q (M, d_q).
    d_input, d_q, hidden = 32, 32, 256
    N, M = 2, 8

    key = jax.random.PRNGKey(0)
    ks = jax.random.split(key, 10)
    scale = 0.1
    params_f32 = {
        "w1": scale * jax.random.normal(ks[0], (d_input, hidden), jnp.float32),
        "b1": scale * jax.random.normal(ks[1], (1, hidden), jnp.float32),
        "w2": scale * jax.random.normal(ks[2], (hidden, hidden), jnp.float32),
        "b2": scale * jax.random.normal(ks[3], (1, hidden), jnp.float32),
        "w3": scale * jax.random.normal(ks[4], (hidden, d_q), jnp.float32),
        "b3": scale * jax.random.normal(ks[5], (1, d_q), jnp.float32),
    }
    x = jax.random.normal(ks[6], (N, d_input), jnp.float32)
    Q = jax.random.normal(ks[7], (M, d_q), jnp.float32)

    prepared = prepare_params(params_f32, d_q)

    # --- N > 1 path (grid = 1 at this size) ---
    attn = jax.block_until_ready(selector_forward(x, Q, prepared))
    ref = jax.block_until_ready(_reference_forward(x, Q, params_f32, d_q))
    assert attn.shape == (M, N), attn.shape
    # Tolerance relaxed vs pure-f32 reference because weights are bf16.
    assert jnp.allclose(attn, ref, atol=2e-2, rtol=2e-2), "mismatch vs reference"
    # Softmax over dim=0: columns must sum to 1 (exact f32 divide -> tight).
    assert jnp.allclose(attn.sum(axis=0), 1.0, atol=1e-4), "softmax not normalized"

    # --- N == 1 path (torch's attn.view(1, -1)) ---
    x1 = jax.random.normal(ks[8], (d_input,), jnp.float32)
    attn1 = jax.block_until_ready(selector_forward(x1, Q, prepared))
    ref1 = jax.block_until_ready(_reference_forward(x1, Q, params_f32, d_q))
    assert attn1.shape == (1, M), attn1.shape
    assert jnp.allclose(attn1, ref1, atol=2e-2, rtol=2e-2), "mismatch (N==1)"
    assert jnp.allclose(attn1.sum(), 1.0, atol=1e-4), "softmax (N==1) not normalized"

    # --- batched path: exercises the grid (2 steps of 128 rows), resident
    #     weights across grid steps, lane-dense output ---
    Nb = 256
    xb = jax.random.normal(ks[9], (Nb, d_input), jnp.float32)
    attn_b = jax.block_until_ready(selector_forward(xb, Q, prepared))
    ref_b = jax.block_until_ready(_reference_forward(xb, Q, params_f32, d_q))
    assert attn_b.shape == (M, Nb), attn_b.shape
    assert jnp.allclose(attn_b, ref_b, atol=2e-2, rtol=2e-2), "mismatch (batched)"
    assert jnp.allclose(attn_b.sum(axis=0), 1.0, atol=1e-4), "softmax (batched)"

    # TODO(synk): findBest / Adam optimizer / save-load are training/host-side
    # logic, not part of the forward hot path, so they are not kernels.
    print("KERNEL_OK")
</pallas_src>

<mosaic_0001>
module attributes {stable_mosaic.version = 11 : i64} {
  func.func @selector_kernel_mn(%arg0: i32, %arg1: memref<2x32xf32, #tpu.memory_space<vmem>>, %arg2: memref<32x256xbf16, #tpu.memory_space<vmem>>, %arg3: memref<1x256xf32, #tpu.memory_space<vmem>>, %arg4: memref<256x256xbf16, #tpu.memory_space<vmem>>, %arg5: memref<1x256xf32, #tpu.memory_space<vmem>>, %arg6: memref<256x32xbf16, #tpu.memory_space<vmem>>, %arg7: memref<1x32xf32, #tpu.memory_space<vmem>>, %arg8: memref<8x32xf32, #tpu.memory_space<vmem>>, %arg9: memref<8x2xf32, #tpu.memory_space<vmem>>) attributes {dimension_semantics = [#tpu.dimension_semantics<parallel>], iteration_bounds = array<i64: 1>, scalar_prefetch = 0 : i64, scratch_operands = 0 : i64, tpu.core_type = #tpu.core_type<tc>, window_params = [{transform_indices = @transform_0, window_bounds = array<i64: 2, 32>}, {pipeline_mode = #tpu.pipeline_mode<synchronous>, transform_indices = @transform_1, window_bounds = array<i64: 32, 256>}, {pipeline_mode = #tpu.pipeline_mode<synchronous>, transform_indices = @transform_2, window_bounds = array<i64: 1, 256>}, {pipeline_mode = #tpu.pipeline_mode<synchronous>, transform_indices = @transform_3, window_bounds = array<i64: 256, 256>}, {pipeline_mode = #tpu.pipeline_mode<synchronous>, transform_indices = @transform_4, window_bounds = array<i64: 1, 256>}, {pipeline_mode = #tpu.pipeline_mode<synchronous>, transform_indices = @transform_5, window_bounds = array<i64: 256, 32>}, {pipeline_mode = #tpu.pipeline_mode<synchronous>, transform_indices = @transform_6, window_bounds = array<i64: 1, 32>}, {pipeline_mode = #tpu.pipeline_mode<synchronous>, transform_indices = @transform_7, window_bounds = array<i64: 8, 32>}, {transform_indices = @transform_8, window_bounds = array<i64: 8, 2>}]} {
    %c0 = arith.constant 0 : index
    %c0_0 = arith.constant 0 : index
    %0 = vector.load %arg1[%c0, %c0_0] : memref<2x32xf32, #tpu.memory_space<vmem>>, vector<2x32xf32>
    %c0_1 = arith.constant 0 : index
    %c0_2 = arith.constant 0 : index
    %1 = vector.load %arg2[%c0_1, %c0_2] : memref<32x256xbf16, #tpu.memory_space<vmem>>, vector<32x256xbf16>
    %2 = arith.extf %1 : vector<32x256xbf16> to vector<32x256xf32>
    %cst = arith.constant dense<0.000000e+00> : vector<2x256xf32>
    %3 = tpu.matmul %0, %2, %cst {dimension_numbers = #tpu.dot_dimension_numbers<[1], [0], [0], [1], [0, 0, 1, 1], [], []>} : vector<2x32xf32>, vector<32x256xf32>, vector<2x256xf32> -> vector<2x256xf32>
    %c0_3 = arith.constant 0 : index
    %c0_4 = arith.constant 0 : index
    %4 = vector.load %arg3[%c0_3, %c0_4] : memref<1x256xf32, #tpu.memory_space<vmem>>, vector<1x256xf32>
    %5 = vector.broadcast %4 : vector<1x256xf32> to vector<2x256xf32>
    %6 = arith.addf %3, %5 : vector<2x256xf32>
    %cst_5 = arith.constant 0.000000e+00 : f32
    %7 = vector.broadcast %cst_5 : f32 to vector<2x256xf32>
    %8 = arith.maximumf %6, %7 : vector<2x256xf32>
    %c0_6 = arith.constant 0 : index
    %c0_7 = arith.constant 0 : index
    %9 = vector.load %arg4[%c0_6, %c0_7] : memref<256x256xbf16, #tpu.memory_space<vmem>>, vector<256x256xbf16>
    %10 = arith.extf %9 : vector<256x256xbf16> to vector<256x256xf32>
    %cst_8 = arith.constant dense<0.000000e+00> : vector<2x256xf32>
    %11 = tpu.matmul %8, %10, %cst_8 {dimension_numbers = #tpu.dot_dimension_numbers<[1], [0], [0], [1], [0, 0, 1, 1], [], []>} : vector<2x256xf32>, vector<256x256xf32>, vector<2x256xf32> -> vector<2x256xf32>
    %c0_9 = arith.constant 0 : index
    %c0_10 = arith.constant 0 : index
    %12 = vector.load %arg5[%c0_9, %c0_10] : memref<1x256xf32, #tpu.memory_space<vmem>>, vector<1x256xf32>
    %13 = vector.broadcast %12 : vector<1x256xf32> to vector<2x256xf32>
    %14 = arith.addf %11, %13 : vector<2x256xf32>
    %cst_11 = arith.constant 0.000000e+00 : f32
    %15 = vector.broadcast %cst_11 : f32 to vector<2x256xf32>
    %16 = arith.maximumf %14, %15 : vector<2x256xf32>
    %c0_12 = arith.constant 0 : index
    %c0_13 = arith.constant 0 : index
    %17 = vector.load %arg6[%c0_12, %c0_13] : memref<256x32xbf16, #tpu.memory_space<vmem>>, vector<256x32xbf16>
    %18 = arith.extf %17 : vector<256x32xbf16> to vector<256x32xf32>
    %cst_14 = arith.constant dense<0.000000e+00> : vector<2x32xf32>
    %19 = tpu.matmul %16, %18, %cst_14 {dimension_numbers = #tpu.dot_dimension_numbers<[1], [0], [0], [1], [0, 0, 1, 1], [], []>} : vector<2x256xf32>, vector<256x32xf32>, vector<2x32xf32> -> vector<2x32xf32>
    %c0_15 = arith.constant 0 : index
    %c0_16 = arith.constant 0 : index
    %20 = vector.load %arg7[%c0_15, %c0_16] : memref<1x32xf32, #tpu.memory_space<vmem>>, vector<1x32xf32>
    %21 = vector.broadcast %20 : vector<1x32xf32> to vector<2x32xf32>
    %22 = arith.addf %19, %21 : vector<2x32xf32>
    %c0_17 = arith.constant 0 : index
    %c0_18 = arith.constant 0 : index
    %23 = vector.load %arg8[%c0_17, %c0_18] : memref<8x32xf32, #tpu.memory_space<vmem>>, vector<8x32xf32>
    %cst_19 = arith.constant dense<0.000000e+00> : vector<8x2xf32>
    %24 = tpu.matmul %23, %22, %cst_19 {dimension_numbers = #tpu.dot_dimension_numbers<[1], [1], [0], [0], [0, 0, 1, 0], [], []>} : vector<8x32xf32>, vector<2x32xf32>, vector<8x2xf32> -> vector<8x2xf32>
    %cst_20 = arith.constant dense<0xFF800000> : vector<2xf32>
    %25 = vector.multi_reduction <maximumf>, %24, %cst_20 [0] : vector<8x2xf32> to vector<2xf32>
    %26 = vector.shape_cast %25 : vector<2xf32> to vector<1x2xf32>
    %27 = vector.broadcast %26 : vector<1x2xf32> to vector<8x2xf32>
    %28 = arith.subf %24, %27 : vector<8x2xf32>
    %29 = math.exp %28 : vector<8x2xf32>
    %cst_21 = arith.constant dense<0.000000e+00> : vector<2xf32>
    %30 = vector.multi_reduction <add>, %29, %cst_21 [0] : vector<8x2xf32> to vector<2xf32>
    %31 = vector.shape_cast %30 : vector<2xf32> to vector<1x2xf32>
    %32 = vector.broadcast %31 : vector<1x2xf32> to vector<8x2xf32>
    %33 = arith.divf %29, %32 : vector<8x2xf32>
    %c0_22 = arith.constant 0 : index
    %c0_23 = arith.constant 0 : index
    %34 = vector.load %arg9[%c0_22, %c0_23] : memref<8x2xf32, #tpu.memory_space<vmem>>, vector<8x2xf32>
    tpu.vector_store %arg9[%c0_22, %c0_23], %33 {strides = array<i32>} : memref<8x2xf32, #tpu.memory_space<vmem>>, vector<8x2xf32>,
    return
  }
  func.func @transform_0(%arg0: i32) -> (i32, i32) {
    %c0_i32 = arith.constant 0 : i32
    %c0_i32_0 = arith.constant 0 : i32
    return %arg0, %c0_i32 : i32, i32
  }
  func.func @transform_1(%arg0: i32) -> (i32, i32) {
    %c0_i32 = arith.constant 0 : i32
    %c0_i32_0 = arith.constant 0 : i32
    %c0_i32_1 = arith.constant 0 : i32
    return %c0_i32, %c0_i32_0 : i32, i32
  }
  func.func @transform_2(%arg0: i32) -> (i32, i32) {
    %c0_i32 = arith.constant 0 : i32
    %c0_i32_0 = arith.constant 0 : i32
    %c0_i32_1 = arith.constant 0 : i32
    return %c0_i32, %c0_i32_0 : i32, i32
  }
  func.func @transform_3(%arg0: i32) -> (i32, i32) {
    %c0_i32 = arith.constant 0 : i32
    %c0_i32_0 = arith.constant 0 : i32
    %c0_i32_1 = arith.constant 0 : i32
    return %c0_i32, %c0_i32_0 : i32, i32
  }
  func.func @transform_4(%arg0: i32) -> (i32, i32) {
    %c0_i32 = arith.constant 0 : i32
    %c0_i32_0 = arith.constant 0 : i32
    %c0_i32_1 = arith.constant 0 : i32
    return %c0_i32, %c0_i32_0 : i32, i32
  }
  func.func @transform_5(%arg0: i32) -> (i32, i32) {
    %c0_i32 = arith.constant 0 : i32
    %c0_i32_0 = arith.constant 0 : i32
    %c0_i32_1 = arith.constant 0 : i32
    return %c0_i32, %c0_i32_0 : i32, i32
  }
  func.func @transform_6(%arg0: i32) -> (i32, i32) {
    %c0_i32 = arith.constant 0 : i32
    %c0_i32_0 = arith.constant 0 : i32
    %c0_i32_1 = arith.constant 0 : i32
    return %c0_i32, %c0_i32_0 : i32, i32
  }
  func.func @transform_7(%arg0: i32) -> (i32, i32) {
    %c0_i32 = arith.constant 0 : i32
    %c0_i32_0 = arith.constant 0 : i32
    %c0_i32_1 = arith.constant 0 : i32
    return %c0_i32, %c0_i32_0 : i32, i32
  }
  func.func @transform_8(%arg0: i32) -> (i32, i32) {
    %c0_i32 = arith.constant 0 : i32
    %c0_i32_0 = arith.constant 0 : i32
    return %c0_i32, %arg0 : i32, i32
  }
}

</mosaic_0001>

<bundles_post_ra>
// kernel: tpu_custom_call.1
= control target key start
LH: loop header
LB: loop body
LE: loop exit
PB: predicated region body
PF: predicated region fallthrough
CT: control target
= control target key end

     0   :  { %13 = vsyncpa [#allocation3], 0  ;;  %s922_s27 = smov [#allocation2]   ;;  %s1071_s0 = inlined_call_operand.vmem [shape: f32[2,32], index: 0, kind: input, shape index: {}]   ;;  %s1072_s1 = inlined_call_operand.vmem [shape: bf16[32,256], index: 1, kind: input, shape index: {}]   ;;  %s1073_s2 = inlined_call_operand.vmem [shape: f32[1,256], index: 2, kind: input, shape index: {}]   ;;  %s1074_s3 = inlined_call_operand.hbm [shape: bf16[256,256], index: 3, kind: input, shape index: {}]   ;;  %s1075_s4 = inlined_call_operand.vmem [shape: f32[1,256], index: 4, kind: input, shape index: {}]   ;;  %s1076_s5 = inlined_call_operand.vmem [shape: bf16[256,32], index: 5, kind: input, shape index: {}]   ;;  %s1077_s6 = inlined_call_operand.vmem [shape: f32[1,32], index: 6, kind: input, shape index: {}]   ;;  %s1078_s7 = inlined_call_operand.vmem [shape: f32[8,32], index: 7, kind: input, shape index: {}]   ;;  %s1079_s8 = inlined_call_operand.vmem [shape: f32[8,2], index: 8, kind: output, shape index: {}]  }
   0x1   :  { %s25_s28 = sshll.u32 %s922_s27, 4  ;;  %s898_s9 = scalar_lea.hbm %s1074_s3, 4096  ;;  %s26_s28 = int_to_ptr.vmem [resolvable:$true] %s25_s28 }
   0x2   :  { %p899_p0 = scmp.ne.s32.totalorder %s1074_s3, %s898_s9  ;;  %p902_p1 = scmp.lt.u32.totalorder %s898_s9, %s1074_s3 }
   0x4   :  { %p904_p2 = pnand %p902_p1, %p899_p0 }
   0x6   :  { %907 = shalt.err (!%p904_p2)
}
   0x7   :  { %s908_s14 = scalar_lea.vmem %s26_s28, 4096  ;;  %p913_p4 = scmp.lt.s32.totalorder %s26_s28, %s26_s28 }
   0x8   :  { %p909_p3 = scmp.ne.s32.totalorder %s26_s28, %s908_s14  ;;  %p914_p5 = scmp.lt.s32.totalorder %s908_s14, %s908_s14 }
   0xa   :  { %p915_p6 = por %p914_p5, %p913_p4 }
   0xc   :  { %p916_p7 = pnand %p915_p6, %p909_p3 }
   0xe   :  { %919 = shalt.err (!%p916_p7)
}
   0xf   :  { %s923_s15 = smov 128   ;;  %s924_s16 = smov 8  }
  0x10   :  { %31 = dma.hbm_to_vmem [thread:$0]  %s1074_s3, 4096, %s26_s28, [#allocation3], %s923_s15, %s923_s15, %s924_s16  }
  0x11   :  { %920 = dma.done.wait [#allocation3], 4096  }
  0x12   :  { %921 = vsyncadd [#allocation3], 4294963200  ;;  %v925_v0 = vmov 0.0   ;;  %v840_v1 = vld [vmem:[%s1072_s1 + $0x4] ss:$8 sps:$4 sm:$0xff]   ;;  %vm68_vm0 = vcmask 261120   ;;  %v58_v51 = vlaneseq }
  0x13   :  { %136 = vmatprep.mubr.f32.mxu0 %v925_v0  ;;  %v842_v2 = vld [vmem:[%s1072_s1] ss:$8 sps:$4 sm:$0xff]   ;;  %696 = vmatprep.subr.bf16.mxu0 %v840_v1  ;;  %v843_v3 = vld [vmem:[%s1072_s1 + $0x14] ss:$8 sps:$4 sm:$0xff]   ;;  %v845_v4 = vld [vmem:[%s1072_s1 + $0x10] ss:$8 sps:$4 sm:$0xff]  }
  0x14   :  { %698 = vmatpush1.bf16.msra.mxu0 %v842_v2  ;;  %v846_v5 = vld [vmem:[#allocation2 + $0x4] ss:$8 sps:$4 sm:$0xff]   ;;  %v848_v6 = vld [vmem:[#allocation2] ss:$8 sps:$4 sm:$0xff]   ;;  %v849_v7 = vld [vmem:[#allocation2 + $0x14] ss:$8 sps:$4 sm:$0xff]  }
  0x15   :  { %700 = vmatprep.subr.bf16.mxu0 %v843_v3  ;;  %704 = vmatprep.subr.bf16.mxu1 %v846_v5  ;;  %v43_v8 = vld [vmem:[%s1071_s0] sm:$0x3]  ;;  %v851_v9 = vld [vmem:[#allocation2 + $0x10] ss:$8 sps:$4 sm:$0xff]   ;;  %v852_v10 = vld [vmem:[#allocation2 + $0x24] ss:$8 sps:$4 sm:$0xff]  }
  0x16   :  { %706 = vmatpush1.bf16.msra.mxu1 %v848_v6  ;;  %v854_v11 = vld [vmem:[#allocation2 + $0x20] ss:$8 sps:$4 sm:$0xff]   ;;  %v855_v12 = vld [vmem:[#allocation2 + $0x34] ss:$8 sps:$4 sm:$0xff]   ;;  %v857_v13 = vld [vmem:[#allocation2 + $0x30] ss:$8 sps:$4 sm:$0xff]  }
  0x17   :  { %708 = vmatprep.subr.bf16.mxu1 %v849_v7  ;;  %v858_v14 = vld [vmem:[#allocation2 + $0x44] ss:$8 sps:$4 sm:$0xff]   ;;  %v860_v15 = vld [vmem:[#allocation2 + $0x40] ss:$8 sps:$4 sm:$0xff]   ;;  %v861_v16 = vld [vmem:[#allocation2 + $0x54] ss:$8 sps:$4 sm:$0xff]  }
  0x18   :  { %702 = vmatpush1.bf16.msra.mxu0 %v845_v4  ;;  %v863_v17 = vld [vmem:[#allocation2 + $0x50] ss:$8 sps:$4 sm:$0xff]   ;;  %v864_v18 = vld [vmem:[#allocation2 + $0x64] ss:$8 sps:$4 sm:$0xff]   ;;  %v866_v19 = vld [vmem:[#allocation2 + $0x60] ss:$8 sps:$4 sm:$0xff]  }
  0x19   :  { %v867_v20 = vld [vmem:[#allocation2 + $0x74] ss:$8 sps:$4 sm:$0xff]   ;;  %v869_v21 = vld [vmem:[#allocation2 + $0x70] ss:$8 sps:$4 sm:$0xff]   ;;  %v870_v22 = vld [vmem:[#allocation2 + $0x84] ss:$8 sps:$4 sm:$0xff]  }
  0x1a   :  { %710 = vmatpush1.bf16.msra.mxu1 %v851_v9  ;;  %v872_v23 = vld [vmem:[#allocation2 + $0x80] ss:$8 sps:$4 sm:$0xff]   ;;  %v873_v24 = vld [vmem:[#allocation2 + $0x94] ss:$8 sps:$4 sm:$0xff]   ;;  %v875_v25 = vld [vmem:[#allocation2 + $0x90] ss:$8 sps:$4 sm:$0xff]  }
  0x1b   :  { %570 = vmatmul.mubr.msk.f32.vlgmr.msra.gmra.mrb[0].mxu0 %vm68_vm0, %v43_v8  ;;  %712 = vmatprep.subr.bf16.mxu1 %v852_v10  ;;  %v876_v26 = vld [vmem:[#allocation2 + $0xa4] ss:$8 sps:$4 sm:$0xff]   ;;  %v878_v27 = vld [vmem:[#allocation2 + $0xa0] ss:$8 sps:$4 sm:$0xff]   ;;  %v879_v28 = vld [vmem:[#allocation2 + $0xb4] ss:$8 sps:$4 sm:$0xff]  }
  0x1c   :  { %v881_v29 = vld [vmem:[#allocation2 + $0xb0] ss:$8 sps:$4 sm:$0xff]   ;;  %v882_v30 = vld [vmem:[#allocation2 + $0xc4] ss:$8 sps:$4 sm:$0xff]   ;;  %v884_v31 = vld [vmem:[#allocation2 + $0xc0] ss:$8 sps:$4 sm:$0xff]  }
  0x1d   :  { %v885_v32 = vld [vmem:[#allocation2 + $0xd4] ss:$8 sps:$4 sm:$0xff]   ;;  %v887_v33 = vld [vmem:[#allocation2 + $0xd0] ss:$8 sps:$4 sm:$0xff]   ;;  %v888_v34 = vld [vmem:[#allocation2 + $0xe4] ss:$8 sps:$4 sm:$0xff]  }
  0x1e   :  { %714 = vmatpush1.bf16.msra.mxu1 %v854_v11  ;;  %v890_v35 = vld [vmem:[#allocation2 + $0xe0] ss:$8 sps:$4 sm:$0xff]   ;;  %v891_v36 = vld [vmem:[#allocation2 + $0xf4] ss:$8 sps:$4 sm:$0xff]   ;;  %v893_v37 = vld [vmem:[#allocation2 + $0xf0] ss:$8 sps:$4 sm:$0xff]  }
  0x1f   :  { %716 = vmatprep.subr.bf16.mxu1 %v855_v12  ;;  %v645_v38 = vld [vmem:[%s1076_s5 + $0x40] sm:$0xff]   ;;  %v646_v40 = vld [vmem:[%s1076_s5 + $0x48] sm:$0xff]   ;;  %v647_v42 = vld [vmem:[%s1076_s5 + $0x50] sm:$0xff]   ;;  %v59_v52 = vshrl.u32 %v58_v51, 7  ;;  %vm926_vm1 = vmmov 0   ;;  %vm544_vm2 = vcmask 15360  }
  0x20   :  { %v575_v39 = vld [vmem:[%s1076_s5] sm:$0xff]   ;;  %768 = vmatprep.subr.bf16.mxu0 %v645_v38  ;;  %v638_v41 = vld [vmem:[%s1076_s5 + $0x8] sm:$0xff]   ;;  %v639_v43 = vld [vmem:[%s1076_s5 + $0x10] sm:$0xff]  }
  0x21   :  { %770 = vmatpush3.bf16.msra.mxu0 %v575_v39  ;;  %v648_v44 = vld [vmem:[%s1076_s5 + $0x58] sm:$0xff]   ;;  %v649_v46 = vld [vmem:[%s1076_s5 + $0x60] sm:$0xff]   ;;  %v650_v48 = vld [vmem:[%s1076_s5 + $0x68] sm:$0xff]   ;;  %v60_v53 = vsub.s32 0, %v59_v52  ;;  %v64_v55 = vsub.s32 1, %v59_v52 }
  0x22   :  { %718 = vmatpush1.bf16.msra.mxu1 %v857_v13  ;;  %772 = vmatprep.subr.bf16.mxu0 %v646_v40  ;;  %v640_v45 = vld [vmem:[%s1076_s5 + $0x18] sm:$0xff]   ;;  %v641_v47 = vld [vmem:[%s1076_s5 + $0x20] sm:$0xff]   ;;  %v642_v49 = vld [vmem:[%s1076_s5 + $0x28] sm:$0xff]  }
  0x23   :  { %720 = vmatprep.subr.bf16.mxu1 %v858_v14  ;;  %v651_v50 = vld [vmem:[%s1076_s5 + $0x70] sm:$0xff]   ;;  %v56_v54 = vld [vmem:[%s1073_s2] sm:$0x3]  ;;  %v652_v2 = vld [vmem:[%s1076_s5 + $0x78] sm:$0xff]  }
  0x24   :  { %v61_v56 = vrot.slane %v56_v54, %v60_v53  ;;  %v65_v57 = vrot.slane %v56_v54, %v64_v55  ;;  %v643_v1 = vld [vmem:[%s1076_s5 + $0x30] sm:$0xff]   ;;  %v644_v3 = vld [vmem:[%s1076_s5 + $0x38] sm:$0xff]   ;;  %v241_v4 = vld [vmem:[%s1075_s4] sm:$0x3] }
  0x25   :  { %774 = vmatpush3.bf16.msra.mxu0 %v638_v41  ;;  %v246_v5 = vrot.slane %v241_v4, %v60_v53  ;;  %v250_v6 = vrot.slane %v241_v4, %v64_v55  ;;  %v571_v14 = vld [vmem:[%s1077_s6] ss:$0 sm:$0xff] }
  0x26   :  { %722 = vmatpush1.bf16.msra.mxu1 %v860_v15  ;;  %776 = vmatprep.subr.bf16.mxu0 %v647_v42 }
  0x27   :  { %724 = vmatprep.subr.bf16.mxu1 %v861_v16 }
  0x29   :  { %778 = vmatpush3.bf16.msra.mxu0 %v639_v43 }
  0x2a   :  { %726 = vmatpush1.bf16.msra.mxu1 %v863_v17  ;;  %780 = vmatprep.subr.bf16.mxu0 %v648_v44 }
  0x2b   :  { %728 = vmatprep.subr.bf16.mxu1 %v864_v18  ;;  %v467_v18 = vld [vmem:[%s1078_s7] sm:$0xff] }
  0x2d   :  { %782 = vmatpush3.bf16.msra.mxu0 %v640_v45 }
  0x2e   :  { %730 = vmatpush1.bf16.msra.mxu1 %v866_v19  ;;  %784 = vmatprep.subr.bf16.mxu0 %v649_v46 }
  0x2f   :  { %732 = vmatprep.subr.bf16.mxu1 %v867_v20 }
  0x31   :  { %786 = vmatpush3.bf16.msra.mxu0 %v641_v47 }
  0x32   :  { %734 = vmatpush1.bf16.msra.mxu1 %v869_v21  ;;  %788 = vmatprep.subr.bf16.mxu0 %v650_v48 }
  0x33   :  { %736 = vmatprep.subr.bf16.mxu1 %v870_v22 }
  0x35   :  { %790 = vmatpush3.bf16.msra.mxu0 %v642_v49 }
  0x36   :  { %738 = vmatpush1.bf16.msra.mxu1 %v872_v23  ;;  %792 = vmatprep.subr.bf16.mxu0 %v651_v50 }
  0x37   :  { %740 = vmatprep.subr.bf16.mxu1 %v873_v24 }
  0x39   :  { %794 = vmatpush3.bf16.msra.mxu0 %v643_v1 }
  0x3a   :  { %742 = vmatpush1.bf16.msra.mxu1 %v875_v25  ;;  %796 = vmatprep.subr.bf16.mxu0 %v652_v2 }
  0x3b   :  { %744 = vmatprep.subr.bf16.mxu1 %v876_v26 }
  0x3d   :  { %798 = vmatpush3.bf16.msra.mxu0 %v644_v3 }
  0x3e   :  { %746 = vmatpush1.bf16.msra.mxu1 %v878_v27  ;;  %690 = vmatprep.subr.mxu0 %v925_v0 }
  0x3f   :  { %748 = vmatprep.subr.bf16.mxu1 %v879_v28 }
  0x42   :  { %750 = vmatpush1.bf16.msra.mxu1 %v881_v29 }
  0x43   :  { %752 = vmatprep.subr.bf16.mxu1 %v882_v30 }
  0x46   :  { %754 = vmatpush1.bf16.msra.mxu1 %v884_v31 }
  0x47   :  { %756 = vmatprep.subr.bf16.mxu1 %v885_v32 }
  0x4a   :  { %758 = vmatpush1.bf16.msra.mxu1 %v887_v33 }
  0x4b   :  { %760 = vmatprep.subr.bf16.mxu1 %v888_v34 }
  0x4e   :  { %762 = vmatpush1.bf16.msra.mxu1 %v890_v35 }
  0x4f   :  { %764 = vmatprep.subr.bf16.mxu1 %v891_v36 }
  0x52   :  { %766 = vmatpush1.bf16.msra.mxu1 %v893_v37 }
  0xee   :  { %v138_v58 = vpop.f32.mrb[0].mxu0 }
  0xef   :  { %v139_v59 = vadd.f32 %v138_v58, %v61_v56  ;;  %v140_v60 = vpop.f32.mrb[1].mxu0 }
  0xf0   :  { %v141_v61 = vadd.f32 %v140_v60, %v65_v57 }
  0xf1   :  { %v143_v63 = vmax.f32 %v139_v59, 0.0 }
  0xf2   :  { %v144_v62 = vmax.f32 %v141_v61, 0.0 }
  0xf4   :  { %317 = vmatprep.mubr.f32.mxu1 %v144_v62 }
  0xf5   :  { %318 = vmatmul.mubr.f32.vlgmr.msra.gmra.mrb[0].mxu1 %v143_v63 }
 0x1c8   :  { %v319_v7 = vpop.f32.mrb[0].mxu1 }
 0x1c9   :  { %v320_v8 = vadd.f32 %v319_v7, %v246_v5  ;;  %v321_v9 = vpop.f32.mrb[1].mxu1 }
 0x1ca   :  { %v322_v10 = vadd.f32 %v321_v9, %v250_v6 }
 0x1cb   :  { %v324_v12 = vmax.f32 %v320_v8, 0.0 }
 0x1cc   :  { %v325_v11 = vmax.f32 %v322_v10, 0.0 }
 0x1ce   :  { %461 = vmatprep.mubr.f32.mxu0 %v325_v11 }
 0x1cf   :  { %462 = vmatmul.mubr.f32.vlgmr.msra.gmra.mrb[2].mxu0 %v324_v12 }
 0x1d0   :  { %692 = vmatprep.mubr.msk.f32.mxu0 %vm926_vm1, %v925_v0 }
 0x2a2   :  { %v685_v13 = vpop.f32.mrb[2].mxu0 }
 0x2a3   :  { %v686_v15 = vpop.f32.mrb[3].mxu0 }
 0x2a4   :  { %v687_v16 = vadd.f32 %v686_v15, %v685_v13 }
 0x2a6   :  { %v464_v17 = vadd.f32 %v687_v16, %v571_v14 }
 0x2a8   :  { %691 = vmatpush3.xpose.msk.msra.mxu0 %vm68_vm0, %v464_v17 }
 0x2ab   :  { %693 = vmatmul.mubr.msk.f32.vlgmr.msra.gmra.mrb[4].mxu0 %vm68_vm0, %v467_v18 }
 0x37e   :  { %v540_v19 = vpop.f32.mrb[4].mxu0 }
 0x37f   :  { %v545_v0 = vsel %vm544_vm2, %v540_v19, -inf  ;;  %v694_v20 = vpop.f32.mrb[5].mxu0 }
 0x380   :  { %v546_v21 = vrot.slane %v545_v0, 4 }
 0x382   :  { %v547_v22 = vmax.f32 %v545_v0, %v546_v21 }
 0x384   :  { %v548_v23 = vrot.slane %v547_v22, 2 }
 0x386   :  { %v549_v24 = vmax.f32 %v547_v22, %v548_v23 }
 0x388   :  { %v550_v25 = vrot.slane %v549_v24, 1 }
 0x38a   :  { %v551_v26 = vmax.f32 %v549_v24, %v550_v25 }
 0x38c   :  { %v552_v27 = vsub.f32 %v540_v19, %v551_v26 }
 0x38e   :  { %v553_v28 = vmul.f32 1.442695, %v552_v27 }
 0x390   :  { %894 = vpow2.f32 %v553_v28 }
 0x39a   :  { %v895_v29 = vpop.eup %894 }
 0x39b   :  { %v555_v30 = vsel %vm544_vm2, %v895_v29, 0.0 }
 0x39c   :  { %v556_v31 = vrot.slane %v555_v30, 4 }
 0x39e   :  { %v557_v32 = vadd.f32 %v556_v31, %v555_v30 }
 0x3a0   :  { %v558_v33 = vrot.slane %v557_v32, 2 }
 0x3a2   :  { %v559_v34 = vadd.f32 %v558_v33, %v557_v32 }
 0x3a4   :  { %v560_v35 = vrot.slane %v559_v34, 1 }
 0x3a6   :  { %v561_v36 = vadd.f32 %v560_v35, %v559_v34 }
 0x3a8   :  { %896 = vrcp.f32 %v561_v36 }
 0x3b2   :  { %v897_v37 = vpop.eup %896 }
 0x3b3   :  { %v563_v38 = vmul.f32 %v897_v37, %v895_v29 }
 0x3b5   :  { %564 = vst.msk [vmem:[%s1079_s8] sm:$0xff] %vm544_vm2, %v563_v38 }
 0x3b6   :  { %569 = vsyncpa [#allocation3], 1 }

</bundles_post_ra>
